<compile_context>
chip_gen: v6e
topology: v6e:2x2x1
jax: 0.10.0
libtpu: 0.0.40
codegen_flags: <defaults>
</compile_context>

<pallas_src>
import math
import jax
import jax.numpy as jnp
import numpy as np
from jax.experimental import pallas as pl
from jax.experimental.pallas import tpu as pltpu


# ----------------------------- Pallas kernel --------------------------------

def lstm_fc_kernel(x_ref, wih_ref, whh_ref, b_ref, wfc_ref, bfc_ref, out_ref):
    """Fused LSTM recurrence (last batch row only) + final Linear.

    x_ref   : (L, I)   input sequence for the last batch element
    wih_ref : (I, 4H)  fused per-gate input weights (i|f|g|o along columns)
    whh_ref : (H, 4H)  fused per-gate recurrent weights
    b_ref   : (1, 4H)  fused combined bias (b_ih + b_hh)
    wfc_ref : (H, O)   final linear weight (transposed)
    bfc_ref : (1, O)   final linear bias
    out_ref : (L, O)   final output
    """
    L, I = x_ref.shape
    H = whh_ref.shape[0]

    whh = whh_ref[...]                                    # (H, 4H), loop-invariant

    # Hoisted input projection + bias: one lane-dense MXU matmul for all steps.
    xg = (jnp.dot(x_ref[...], wih_ref[...],
                  preferred_element_type=jnp.float32)
          + b_ref[...])                                   # (L, 4H)

    h = jnp.zeros((1, H), jnp.float32)
    c = jnp.zeros((1, H), jnp.float32)
    h_rows = []
    # L is small and static -> full static unroll; h/c stay in vregs as carries.
    for t in range(L):
        gates = xg[t:t + 1, :] + jnp.dot(h, whh,
                                         preferred_element_type=jnp.float32)  # (1, 4H)
        # Two transcendental passes over the full 128-lane gate tile
        # (instead of four quarter-width ones), then static lane slices.
        sig = jax.nn.sigmoid(gates)
        tnh = jnp.tanh(gates)
        i_g = sig[:, 0 * H:1 * H]
        f_g = sig[:, 1 * H:2 * H]
        g_g = tnh[:, 2 * H:3 * H]
        o_g = sig[:, 3 * H:4 * H]
        c = f_g * c + i_g * g_g
        h = o_g * jnp.tanh(c)
        h_rows.append(h)

    # (L, H) slab built in registers, fed straight into the fused final FC.
    h_slab = jnp.concatenate(h_rows, axis=0)              # (L, H)
    out_ref[...] = (jnp.dot(h_slab, wfc_ref[...],
                            preferred_element_type=jnp.float32)
                    + bfc_ref[...]).astype(out_ref.dtype)


# ------------------------------- Wrapper -------------------------------------

def lstm_forward(x, params):
    """Pallas implementation of the PyTorch LSTM module forward pass.

    x: (L, B, I) float32
    returns: (L, O) float32   (because of out[:, -1, :] with batch_first=False)
    """
    L, B, I = x.shape
    w_ih, w_hh, bias, w_fc_t, b_fc = (params["w_ih"], params["w_hh"],
                                      params["bias"], params["w_fc_t"],
                                      params["b_fc"])
    H = w_hh.shape[0]
    O = w_fc_t.shape[-1]

    # Only the last batch row is ever consumed by out[:, -1, :].
    x_last = x[:, -1, :]                                  # (L, I)

    vmem = pl.BlockSpec(memory_space=pltpu.MemorySpace.VMEM)
    return pl.pallas_call(
        lstm_fc_kernel,
        out_shape=jax.ShapeDtypeStruct((L, O), jnp.float32),
        in_specs=[vmem] * 6,
        out_specs=vmem,
    )(x_last, w_ih, w_hh, bias, w_fc_t, b_fc)


# --------------------------- Parameter creation ------------------------------

def init_params(key, input_size, hidden_size, output_size):
    """Deterministic init mirroring PyTorch's default U(-1/sqrt(H), 1/sqrt(H))."""
    k_lstm = 1.0 / math.sqrt(hidden_size)
    k_fc = 1.0 / math.sqrt(hidden_size)
    ks = jax.random.split(key, 6)

    weight_ih = jax.random.uniform(ks[0], (4 * hidden_size, input_size),
                                   jnp.float32, -k_lstm, k_lstm)
    weight_hh = jax.random.uniform(ks[1], (4 * hidden_size, hidden_size),
                                   jnp.float32, -k_lstm, k_lstm)
    b_ih = jax.random.uniform(ks[2], (4 * hidden_size,), jnp.float32,
                              -k_lstm, k_lstm)
    b_hh = jax.random.uniform(ks[3], (4 * hidden_size,), jnp.float32,
                              -k_lstm, k_lstm)
    fc_w = jax.random.uniform(ks[4], (output_size, hidden_size), jnp.float32,
                              -k_fc, k_fc)
    fc_b = jax.random.uniform(ks[5], (output_size,), jnp.float32, -k_fc, k_fc)

    params = {
        # Fused gate layout (gate order i|f|g|o along the 4H axis):
        "w_ih": weight_ih.T,                                 # (I, 4H)
        "w_hh": weight_hh.T,                                 # (H, 4H)
        "bias": (b_ih + b_hh).reshape(1, 4 * hidden_size),   # (1, 4H)
        "w_fc_t": fc_w.T,                                    # (H, O)
        "b_fc": fc_b.reshape(1, output_size),                # (1, O)
    }
    raw = (weight_ih, weight_hh, b_ih, b_hh, fc_w, fc_b)
    return params, raw


# --------------------------- Pure-JAX reference ------------------------------

def reference_forward(x, raw):
    weight_ih, weight_hh, b_ih, b_hh, fc_w, fc_b = raw
    L, B, I = x.shape
    H = weight_hh.shape[1]

    def step(carry, x_t):
        h, c = carry
        gates = x_t @ weight_ih.T + b_ih + h @ weight_hh.T + b_hh
        i_g = jax.nn.sigmoid(gates[:, 0 * H:1 * H])
        f_g = jax.nn.sigmoid(gates[:, 1 * H:2 * H])
        g_g = jnp.tanh(gates[:, 2 * H:3 * H])
        o_g = jax.nn.sigmoid(gates[:, 3 * H:4 * H])
        c_new = f_g * c + i_g * g_g
        h_new = o_g * jnp.tanh(c_new)
        return (h_new, c_new), h_new

    h0 = jnp.zeros((B, H), jnp.float32)
    c0 = jnp.zeros((B, H), jnp.float32)
    _, out = jax.lax.scan(step, (h0, c0), x)   # (L, B, H)
    return out[:, -1, :] @ fc_w.T + fc_b       # (L, O)


# ------------------------------------ Main -----------------------------------

if __name__ == "__main__":
    L, B = 8, 4                 # seq_len, batch
    input_size, hidden_size, output_size = 16, 32, 8

    key = jax.random.PRNGKey(0)
    kx, kp = jax.random.split(key)
    x = jax.random.normal(kx, (L, B, input_size), jnp.float32)

    params, raw = init_params(kp, input_size, hidden_size, output_size)

    out = lstm_forward(x, params)
    out = jax.block_until_ready(out)

    ref = reference_forward(x, raw)
    np.testing.assert_allclose(np.asarray(out), np.asarray(ref),
                               rtol=1e-5, atol=1e-5)

    print("KERNEL_OK")
</pallas_src>

<mosaic_0001>
module attributes {stable_mosaic.version = 11 : i64} {
  func.func @lstm_fc_kernel(%arg0: memref<8x16xf32, #tpu.memory_space<vmem>>, %arg1: memref<16x128xf32, #tpu.memory_space<vmem>>, %arg2: memref<32x128xf32, #tpu.memory_space<vmem>>, %arg3: memref<1x128xf32, #tpu.memory_space<vmem>>, %arg4: memref<32x8xf32, #tpu.memory_space<vmem>>, %arg5: memref<1x8xf32, #tpu.memory_space<vmem>>, %arg6: memref<8x8xf32, #tpu.memory_space<vmem>>) attributes {dimension_semantics = [], scalar_prefetch = 0 : i64, scratch_operands = 0 : i64, tpu.core_type = #tpu.core_type<tc>} {
    %c0 = arith.constant 0 : index
    %c0_0 = arith.constant 0 : index
    %0 = vector.load %arg2[%c0, %c0_0] : memref<32x128xf32, #tpu.memory_space<vmem>>, vector<32x128xf32>
    %c0_1 = arith.constant 0 : index
    %c0_2 = arith.constant 0 : index
    %1 = vector.load %arg0[%c0_1, %c0_2] : memref<8x16xf32, #tpu.memory_space<vmem>>, vector<8x16xf32>
    %c0_3 = arith.constant 0 : index
    %c0_4 = arith.constant 0 : index
    %2 = vector.load %arg1[%c0_3, %c0_4] : memref<16x128xf32, #tpu.memory_space<vmem>>, vector<16x128xf32>
    %cst = arith.constant dense<0.000000e+00> : vector<8x128xf32>
    %3 = tpu.matmul %1, %2, %cst {dimension_numbers = #tpu.dot_dimension_numbers<[1], [0], [0], [1], [0, 0, 1, 1], [], []>} : vector<8x16xf32>, vector<16x128xf32>, vector<8x128xf32> -> vector<8x128xf32>
    %c0_5 = arith.constant 0 : index
    %c0_6 = arith.constant 0 : index
    %4 = vector.load %arg3[%c0_5, %c0_6] : memref<1x128xf32, #tpu.memory_space<vmem>>, vector<1x128xf32>
    %5 = vector.broadcast %4 : vector<1x128xf32> to vector<8x128xf32>
    %6 = arith.addf %3, %5 : vector<8x128xf32>
    %cst_7 = arith.constant 0.000000e+00 : f32
    %7 = vector.broadcast %cst_7 : f32 to vector<1x32xf32>
    %cst_8 = arith.constant 0.000000e+00 : f32
    %8 = vector.broadcast %cst_8 : f32 to vector<1x32xf32>
    %9 = vector.extract_strided_slice %6 {offsets = [0, 0], sizes = [1, 128], strides = [1, 1]} : vector<8x128xf32> to vector<1x128xf32>
    %cst_9 = arith.constant dense<0.000000e+00> : vector<1x128xf32>
    %10 = tpu.matmul %7, %0, %cst_9 {dimension_numbers = #tpu.dot_dimension_numbers<[1], [0], [0], [1], [0, 0, 1, 1], [], []>} : vector<1x32xf32>, vector<32x128xf32>, vector<1x128xf32> -> vector<1x128xf32>
    %11 = arith.addf %9, %10 : vector<1x128xf32>
    %12 = arith.negf %11 : vector<1x128xf32>
    %13 = math.exp %12 : vector<1x128xf32>
    %cst_10 = arith.constant 1.000000e+00 : f32
    %14 = vector.broadcast %cst_10 : f32 to vector<1x128xf32>
    %15 = arith.addf %14, %13 : vector<1x128xf32>
    %16 = arith.divf %14, %15 : vector<1x128xf32>
    %17 = math.tanh %11 : vector<1x128xf32>
    %18 = vector.extract_strided_slice %16 {offsets = [0, 0], sizes = [1, 32], strides = [1, 1]} : vector<1x128xf32> to vector<1x32xf32>
    %19 = vector.extract_strided_slice %16 {offsets = [0, 32], sizes = [1, 32], strides = [1, 1]} : vector<1x128xf32> to vector<1x32xf32>
    %20 = vector.extract_strided_slice %17 {offsets = [0, 64], sizes = [1, 32], strides = [1, 1]} : vector<1x128xf32> to vector<1x32xf32>
    %21 = vector.extract_strided_slice %16 {offsets = [0, 96], sizes = [1, 32], strides = [1, 1]} : vector<1x128xf32> to vector<1x32xf32>
    %22 = arith.mulf %19, %8 : vector<1x32xf32>
    %23 = arith.mulf %18, %20 : vector<1x32xf32>
    %24 = arith.addf %22, %23 : vector<1x32xf32>
    %25 = math.tanh %24 : vector<1x32xf32>
    %26 = arith.mulf %21, %25 : vector<1x32xf32>
    %27 = vector.extract_strided_slice %6 {offsets = [1, 0], sizes = [1, 128], strides = [1, 1]} : vector<8x128xf32> to vector<1x128xf32>
    %cst_11 = arith.constant dense<0.000000e+00> : vector<1x128xf32>
    %28 = tpu.matmul %26, %0, %cst_11 {dimension_numbers = #tpu.dot_dimension_numbers<[1], [0], [0], [1], [0, 0, 1, 1], [], []>} : vector<1x32xf32>, vector<32x128xf32>, vector<1x128xf32> -> vector<1x128xf32>
    %29 = arith.addf %27, %28 : vector<1x128xf32>
    %30 = arith.negf %29 : vector<1x128xf32>
    %31 = math.exp %30 : vector<1x128xf32>
    %cst_12 = arith.constant 1.000000e+00 : f32
    %32 = vector.broadcast %cst_12 : f32 to vector<1x128xf32>
    %33 = arith.addf %32, %31 : vector<1x128xf32>
    %34 = arith.divf %32, %33 : vector<1x128xf32>
    %35 = math.tanh %29 : vector<1x128xf32>
    %36 = vector.extract_strided_slice %34 {offsets = [0, 0], sizes = [1, 32], strides = [1, 1]} : vector<1x128xf32> to vector<1x32xf32>
    %37 = vector.extract_strided_slice %34 {offsets = [0, 32], sizes = [1, 32], strides = [1, 1]} : vector<1x128xf32> to vector<1x32xf32>
    %38 = vector.extract_strided_slice %35 {offsets = [0, 64], sizes = [1, 32], strides = [1, 1]} : vector<1x128xf32> to vector<1x32xf32>
    %39 = vector.extract_strided_slice %34 {offsets = [0, 96], sizes = [1, 32], strides = [1, 1]} : vector<1x128xf32> to vector<1x32xf32>
    %40 = arith.mulf %37, %24 : vector<1x32xf32>
    %41 = arith.mulf %36, %38 : vector<1x32xf32>
    %42 = arith.addf %40, %41 : vector<1x32xf32>
    %43 = math.tanh %42 : vector<1x32xf32>
    %44 = arith.mulf %39, %43 : vector<1x32xf32>
    %45 = vector.extract_strided_slice %6 {offsets = [2, 0], sizes = [1, 128], strides = [1, 1]} : vector<8x128xf32> to vector<1x128xf32>
    %cst_13 = arith.constant dense<0.000000e+00> : vector<1x128xf32>
    %46 = tpu.matmul %44, %0, %cst_13 {dimension_numbers = #tpu.dot_dimension_numbers<[1], [0], [0], [1], [0, 0, 1, 1], [], []>} : vector<1x32xf32>, vector<32x128xf32>, vector<1x128xf32> -> vector<1x128xf32>
    %47 = arith.addf %45, %46 : vector<1x128xf32>
    %48 = arith.negf %47 : vector<1x128xf32>
    %49 = math.exp %48 : vector<1x128xf32>
    %cst_14 = arith.constant 1.000000e+00 : f32
    %50 = vector.broadcast %cst_14 : f32 to vector<1x128xf32>
    %51 = arith.addf %50, %49 : vector<1x128xf32>
    %52 = arith.divf %50, %51 : vector<1x128xf32>
    %53 = math.tanh %47 : vector<1x128xf32>
    %54 = vector.extract_strided_slice %52 {offsets = [0, 0], sizes = [1, 32], strides = [1, 1]} : vector<1x128xf32> to vector<1x32xf32>
    %55 = vector.extract_strided_slice %52 {offsets = [0, 32], sizes = [1, 32], strides = [1, 1]} : vector<1x128xf32> to vector<1x32xf32>
    %56 = vector.extract_strided_slice %53 {offsets = [0, 64], sizes = [1, 32], strides = [1, 1]} : vector<1x128xf32> to vector<1x32xf32>
    %57 = vector.extract_strided_slice %52 {offsets = [0, 96], sizes = [1, 32], strides = [1, 1]} : vector<1x128xf32> to vector<1x32xf32>
    %58 = arith.mulf %55, %42 : vector<1x32xf32>
    %59 = arith.mulf %54, %56 : vector<1x32xf32>
    %60 = arith.addf %58, %59 : vector<1x32xf32>
    %61 = math.tanh %60 : vector<1x32xf32>
    %62 = arith.mulf %57, %61 : vector<1x32xf32>
    %63 = vector.extract_strided_slice %6 {offsets = [3, 0], sizes = [1, 128], strides = [1, 1]} : vector<8x128xf32> to vector<1x128xf32>
    %cst_15 = arith.constant dense<0.000000e+00> : vector<1x128xf32>
    %64 = tpu.matmul %62, %0, %cst_15 {dimension_numbers = #tpu.dot_dimension_numbers<[1], [0], [0], [1], [0, 0, 1, 1], [], []>} : vector<1x32xf32>, vector<32x128xf32>, vector<1x128xf32> -> vector<1x128xf32>
    %65 = arith.addf %63, %64 : vector<1x128xf32>
    %66 = arith.negf %65 : vector<1x128xf32>
    %67 = math.exp %66 : vector<1x128xf32>
    %cst_16 = arith.constant 1.000000e+00 : f32
    %68 = vector.broadcast %cst_16 : f32 to vector<1x128xf32>
    %69 = arith.addf %68, %67 : vector<1x128xf32>
    %70 = arith.divf %68, %69 : vector<1x128xf32>
    %71 = math.tanh %65 : vector<1x128xf32>
    %72 = vector.extract_strided_slice %70 {offsets = [0, 0], sizes = [1, 32], strides = [1, 1]} : vector<1x128xf32> to vector<1x32xf32>
    %73 = vector.extract_strided_slice %70 {offsets = [0, 32], sizes = [1, 32], strides = [1, 1]} : vector<1x128xf32> to vector<1x32xf32>
    %74 = vector.extract_strided_slice %71 {offsets = [0, 64], sizes = [1, 32], strides = [1, 1]} : vector<1x128xf32> to vector<1x32xf32>
    %75 = vector.extract_strided_slice %70 {offsets = [0, 96], sizes = [1, 32], strides = [1, 1]} : vector<1x128xf32> to vector<1x32xf32>
    %76 = arith.mulf %73, %60 : vector<1x32xf32>
    %77 = arith.mulf %72, %74 : vector<1x32xf32>
    %78 = arith.addf %76, %77 : vector<1x32xf32>
    %79 = math.tanh %78 : vector<1x32xf32>
    %80 = arith.mulf %75, %79 : vector<1x32xf32>
    %81 = vector.extract_strided_slice %6 {offsets = [4, 0], sizes = [1, 128], strides = [1, 1]} : vector<8x128xf32> to vector<1x128xf32>
    %cst_17 = arith.constant dense<0.000000e+00> : vector<1x128xf32>
    %82 = tpu.matmul %80, %0, %cst_17 {dimension_numbers = #tpu.dot_dimension_numbers<[1], [0], [0], [1], [0, 0, 1, 1], [], []>} : vector<1x32xf32>, vector<32x128xf32>, vector<1x128xf32> -> vector<1x128xf32>
    %83 = arith.addf %81, %82 : vector<1x128xf32>
    %84 = arith.negf %83 : vector<1x128xf32>
    %85 = math.exp %84 : vector<1x128xf32>
    %cst_18 = arith.constant 1.000000e+00 : f32
    %86 = vector.broadcast %cst_18 : f32 to vector<1x128xf32>
    %87 = arith.addf %86, %85 : vector<1x128xf32>
    %88 = arith.divf %86, %87 : vector<1x128xf32>
    %89 = math.tanh %83 : vector<1x128xf32>
    %90 = vector.extract_strided_slice %88 {offsets = [0, 0], sizes = [1, 32], strides = [1, 1]} : vector<1x128xf32> to vector<1x32xf32>
    %91 = vector.extract_strided_slice %88 {offsets = [0, 32], sizes = [1, 32], strides = [1, 1]} : vector<1x128xf32> to vector<1x32xf32>
    %92 = vector.extract_strided_slice %89 {offsets = [0, 64], sizes = [1, 32], strides = [1, 1]} : vector<1x128xf32> to vector<1x32xf32>
    %93 = vector.extract_strided_slice %88 {offsets = [0, 96], sizes = [1, 32], strides = [1, 1]} : vector<1x128xf32> to vector<1x32xf32>
    %94 = arith.mulf %91, %78 : vector<1x32xf32>
    %95 = arith.mulf %90, %92 : vector<1x32xf32>
    %96 = arith.addf %94, %95 : vector<1x32xf32>
    %97 = math.tanh %96 : vector<1x32xf32>
    %98 = arith.mulf %93, %97 : vector<1x32xf32>
    %99 = vector.extract_strided_slice %6 {offsets = [5, 0], sizes = [1, 128], strides = [1, 1]} : vector<8x128xf32> to vector<1x128xf32>
    %cst_19 = arith.constant dense<0.000000e+00> : vector<1x128xf32>
    %100 = tpu.matmul %98, %0, %cst_19 {dimension_numbers = #tpu.dot_dimension_numbers<[1], [0], [0], [1], [0, 0, 1, 1], [], []>} : vector<1x32xf32>, vector<32x128xf32>, vector<1x128xf32> -> vector<1x128xf32>
    %101 = arith.addf %99, %100 : vector<1x128xf32>
    %102 = arith.negf %101 : vector<1x128xf32>
    %103 = math.exp %102 : vector<1x128xf32>
    %cst_20 = arith.constant 1.000000e+00 : f32
    %104 = vector.broadcast %cst_20 : f32 to vector<1x128xf32>
    %105 = arith.addf %104, %103 : vector<1x128xf32>
    %106 = arith.divf %104, %105 : vector<1x128xf32>
    %107 = math.tanh %101 : vector<1x128xf32>
    %108 = vector.extract_strided_slice %106 {offsets = [0, 0], sizes = [1, 32], strides = [1, 1]} : vector<1x128xf32> to vector<1x32xf32>
    %109 = vector.extract_strided_slice %106 {offsets = [0, 32], sizes = [1, 32], strides = [1, 1]} : vector<1x128xf32> to vector<1x32xf32>
    %110 = vector.extract_strided_slice %107 {offsets = [0, 64], sizes = [1, 32], strides = [1, 1]} : vector<1x128xf32> to vector<1x32xf32>
    %111 = vector.extract_strided_slice %106 {offsets = [0, 96], sizes = [1, 32], strides = [1, 1]} : vector<1x128xf32> to vector<1x32xf32>
    %112 = arith.mulf %109, %96 : vector<1x32xf32>
    %113 = arith.mulf %108, %110 : vector<1x32xf32>
    %114 = arith.addf %112, %113 : vector<1x32xf32>
    %115 = math.tanh %114 : vector<1x32xf32>
    %116 = arith.mulf %111, %115 : vector<1x32xf32>
    %117 = vector.extract_strided_slice %6 {offsets = [6, 0], sizes = [1, 128], strides = [1, 1]} : vector<8x128xf32> to vector<1x128xf32>
    %cst_21 = arith.constant dense<0.000000e+00> : vector<1x128xf32>
    %118 = tpu.matmul %116, %0, %cst_21 {dimension_numbers = #tpu.dot_dimension_numbers<[1], [0], [0], [1], [0, 0, 1, 1], [], []>} : vector<1x32xf32>, vector<32x128xf32>, vector<1x128xf32> -> vector<1x128xf32>
    %119 = arith.addf %117, %118 : vector<1x128xf32>
    %120 = arith.negf %119 : vector<1x128xf32>
    %121 = math.exp %120 : vector<1x128xf32>
    %cst_22 = arith.constant 1.000000e+00 : f32
    %122 = vector.broadcast %cst_22 : f32 to vector<1x128xf32>
    %123 = arith.addf %122, %121 : vector<1x128xf32>
    %124 = arith.divf %122, %123 : vector<1x128xf32>
    %125 = math.tanh %119 : vector<1x128xf32>
    %126 = vector.extract_strided_slice %124 {offsets = [0, 0], sizes = [1, 32], strides = [1, 1]} : vector<1x128xf32> to vector<1x32xf32>
    %127 = vector.extract_strided_slice %124 {offsets = [0, 32], sizes = [1, 32], strides = [1, 1]} : vector<1x128xf32> to vector<1x32xf32>
    %128 = vector.extract_strided_slice %125 {offsets = [0, 64], sizes = [1, 32], strides = [1, 1]} : vector<1x128xf32> to vector<1x32xf32>
    %129 = vector.extract_strided_slice %124 {offsets = [0, 96], sizes = [1, 32], strides = [1, 1]} : vector<1x128xf32> to vector<1x32xf32>
    %130 = arith.mulf %127, %114 : vector<1x32xf32>
    %131 = arith.mulf %126, %128 : vector<1x32xf32>
    %132 = arith.addf %130, %131 : vector<1x32xf32>
    %133 = math.tanh %132 : vector<1x32xf32>
    %134 = arith.mulf %129, %133 : vector<1x32xf32>
    %135 = vector.extract_strided_slice %6 {offsets = [7, 0], sizes = [1, 128], strides = [1, 1]} : vector<8x128xf32> to vector<1x128xf32>
    %cst_23 = arith.constant dense<0.000000e+00> : vector<1x128xf32>
    %136 = tpu.matmul %134, %0, %cst_23 {dimension_numbers = #tpu.dot_dimension_numbers<[1], [0], [0], [1], [0, 0, 1, 1], [], []>} : vector<1x32xf32>, vector<32x128xf32>, vector<1x128xf32> -> vector<1x128xf32>
    %137 = arith.addf %135, %136 : vector<1x128xf32>
    %138 = arith.negf %137 : vector<1x128xf32>
    %139 = math.exp %138 : vector<1x128xf32>
    %cst_24 = arith.constant 1.000000e+00 : f32
    %140 = vector.broadcast %cst_24 : f32 to vector<1x128xf32>
    %141 = arith.addf %140, %139 : vector<1x128xf32>
    %142 = arith.divf %140, %141 : vector<1x128xf32>
    %143 = math.tanh %137 : vector<1x128xf32>
    %144 = vector.extract_strided_slice %142 {offsets = [0, 0], sizes = [1, 32], strides = [1, 1]} : vector<1x128xf32> to vector<1x32xf32>
    %145 = vector.extract_strided_slice %142 {offsets = [0, 32], sizes = [1, 32], strides = [1, 1]} : vector<1x128xf32> to vector<1x32xf32>
    %146 = vector.extract_strided_slice %143 {offsets = [0, 64], sizes = [1, 32], strides = [1, 1]} : vector<1x128xf32> to vector<1x32xf32>
    %147 = vector.extract_strided_slice %142 {offsets = [0, 96], sizes = [1, 32], strides = [1, 1]} : vector<1x128xf32> to vector<1x32xf32>
    %148 = arith.mulf %145, %132 : vector<1x32xf32>
    %149 = arith.mulf %144, %146 : vector<1x32xf32>
    %150 = arith.addf %148, %149 : vector<1x32xf32>
    %151 = math.tanh %150 : vector<1x32xf32>
    %152 = arith.mulf %147, %151 : vector<1x32xf32>
    %153 = tpu.concatenate %26, %44, %62, %80, %98, %116, %134, %152 in 0 : vector<1x32xf32>, vector<1x32xf32>, vector<1x32xf32>, vector<1x32xf32>, vector<1x32xf32>, vector<1x32xf32>, vector<1x32xf32>, vector<1x32xf32> -> vector<8x32xf32>
    %c0_25 = arith.constant 0 : index
    %c0_26 = arith.constant 0 : index
    %154 = vector.load %arg4[%c0_25, %c0_26] : memref<32x8xf32, #tpu.memory_space<vmem>>, vector<32x8xf32>
    %cst_27 = arith.constant dense<0.000000e+00> : vector<8x8xf32>
    %155 = tpu.matmul %153, %154, %cst_27 {dimension_numbers = #tpu.dot_dimension_numbers<[1], [0], [0], [1], [0, 0, 1, 1], [], []>} : vector<8x32xf32>, vector<32x8xf32>, vector<8x8xf32> -> vector<8x8xf32>
    %c0_28 = arith.constant 0 : index
    %c0_29 = arith.constant 0 : index
    %156 = vector.load %arg5[%c0_28, %c0_29] : memref<1x8xf32, #tpu.memory_space<vmem>>, vector<1x8xf32>
    %157 = vector.broadcast %156 : vector<1x8xf32> to vector<8x8xf32>
    %158 = arith.addf %155, %157 : vector<8x8xf32>
    %c0_30 = arith.constant 0 : index
    %c0_31 = arith.constant 0 : index
    %159 = vector.load %arg6[%c0_30, %c0_31] : memref<8x8xf32, #tpu.memory_space<vmem>>, vector<8x8xf32>
    tpu.vector_store %arg6[%c0_30, %c0_31], %158 {strides = array<i32>} : memref<8x8xf32, #tpu.memory_space<vmem>>, vector<8x8xf32>,
    return
  }
}

</mosaic_0001>

<bundles_post_ra>
// kernel: tpu_custom_call.1
= control target key start
LH: loop header
LB: loop body
LE: loop exit
PB: predicated region body
PF: predicated region fallthrough
CT: control target
= control target key end

     0   :  { %11 = vsyncpa [#allocation3], 0  ;;  %s1614_s0 = inlined_call_operand.vmem [shape: f32[8,16], index: 0, kind: input, shape index: {}]   ;;  %s1615_s1 = inlined_call_operand.hbm [shape: f32[16,128], index: 1, kind: input, shape index: {}]   ;;  %s1616_s2 = inlined_call_operand.vmem [shape: f32[32,128], index: 2, kind: input, shape index: {}]   ;;  %s1617_s3 = inlined_call_operand.vmem [shape: f32[1,128], index: 3, kind: input, shape index: {}]   ;;  %s1618_s4 = inlined_call_operand.vmem [shape: f32[32,8], index: 4, kind: input, shape index: {}]   ;;  %s1619_s5 = inlined_call_operand.vmem [shape: f32[1,8], index: 5, kind: input, shape index: {}]   ;;  %s1620_s6 = inlined_call_operand.hbm [shape: f32[8,8], index: 6, kind: output, shape index: {}]  }
   0x1   :  { %12 = vsyncpa [#allocation4], 0  ;;  %s1379_s21 = smov [#allocation2]  }
   0x2   :  { %s20_s22 = sshll.u32 %s1379_s21, 4  ;;  %s21_s22 = int_to_ptr.vmem [resolvable:$true] %s20_s22 }
   0x3   :  { %s1343_s23 = scalar_lea.vmem %s21_s22, 256  ;;  %p1348_p1 = scmp.lt.s32.totalorder %s21_s22, %s21_s22 }
   0x4   :  { %p1344_p0 = scmp.ne.s32.totalorder %s21_s22, %s1343_s23  ;;  %p1349_p2 = scmp.lt.s32.totalorder %s1343_s23, %s1343_s23 }
   0x6   :  { %p1350_p3 = por %p1349_p2, %p1348_p1 }
   0x8   :  { %p1351_p4 = pnand %p1350_p3, %p1344_p0 }
   0xa   :  { %1354 = shalt.err (!%p1351_p4)
}
   0xb   :  { %s1380_s24 = smov 128   ;;  %s1381_s25 = smov 8  }
   0xc   :  { %26 = dma.hbm_to_vmem [thread:$0]  %s1615_s1, 256, %s21_s22, [#allocation3], %s1380_s24, %s1380_s24, %s1381_s25  }
   0xd   :  { %1375 = dma.done.wait [#allocation3], 256  }
   0xe   :  { %1376 = vsyncadd [#allocation3], 4294967040  ;;  %v1382_v0 = vmov 0.0   ;;  %vm1383_vm0 = vmmov 0   ;;  %v44_v1 = vld [vmem:[#allocation2 + $0x8] sm:$0xff]  ;;  %v1434_v2 = vld [vmem:[%s1616_s2 + $0x18] sm:$0xff] }
   0xf   :  { %1157 = vmatprep.subr.mxu0 %v1382_v0  ;;  %1164 = vmatprep.subr.mxu1 %v1382_v0  ;;  %v43_v3 = vld [vmem:[#allocation2] sm:$0xff]  ;;  %v1440_v4 = vld [vmem:[%s1616_s2 + $0x10] sm:$0xff]  ;;  %vm52_vm1 = vcmask 130048   ;;  %v1450_v6 = vld [vmem:[%s1616_s2 + $0x8] sm:$0xff]  ;;  %s1384_s13 = smov 64   ;;  %vm126_vm2 = vcmask 261120  }
  0x10   :  { %1161 = vmatprep.mubr.msk.f32.mxu0 %vm1383_vm0, %v1382_v0  ;;  %1172 = vmatprep.mubr.msk.f32.mxu1 %vm1383_vm0, %v1382_v0  ;;  %v42_v5 = vld [vmem:[%s1614_s0] sm:$0xff]  ;;  %vm973_vm3 = vcmask 1040384   ;;  %vm975_vm4 = vcmask 1041408   ;;  %vm977_vm5 = vcmask 1042432   ;;  %vm979_vm6 = vcmask 1043456  }
  0x11   :  { %1158 = vmatpush3.msra.mxu0 %v44_v1  ;;  %1165 = vmatpush3.msra.mxu1 %v1434_v2  ;;  %v1457_v7 = vld [vmem:[%s1616_s2] sm:$0xff]  ;;  %vm981_vm7 = vcmask 1044480   ;;  %vm983_vm8 = vcmask 1045504   ;;  %vm985_vm9 = vcmask 1046528   ;;  %vm1073_vm10 = vcmask 64512  }
  0x12   :  { %1159 = vmatprep.subr.mxu0 %v1382_v0  ;;  %1166 = vmatprep.subr.mxu1 %v1382_v0  ;;  %v1090_v8 = vld [vmem:[%s1617_s3] ss:$0 sm:$0xff]  ;;  %s1385_s3 = smov 32  }
  0x13   :  { %1160 = vmatpush3.msra.mxu0 %v43_v3  ;;  %1167 = vmatpush3.msra.mxu1 %v1440_v4 }
  0x14   :  { %1162 = vmatmul.mubr.msk.f32.vlgmr.msra.gmra.mxu0 %vm52_vm1, %v42_v5  ;;  %1168 = vmatprep.subr.mxu1 %v1382_v0 }
  0x15   :  { %1169 = vmatpush3.msra.mxu1 %v1450_v6  ;;  %1175 = vmatprep.subr.mxu0 %v1382_v0 }
  0x16   :  { %1170 = vmatprep.subr.mxu1 %v1382_v0  ;;  %1176 = vmatpush3.msra.mxu0 %v1434_v2 }
  0x17   :  { %1171 = vmatpush3.msra.mxu1 %v1457_v7  ;;  %1177 = vmatprep.subr.mxu0 %v1382_v0 }
  0x18   :  { %1173 = vmatmul.mubr.f32.vlgmr.msra.gmra.mxu1 %v1382_v0  ;;  %1178 = vmatpush3.msra.mxu0 %v1440_v4 }
  0x19   :  { %1179 = vmatprep.subr.mxu0 %v1382_v0  ;;  %1183 = vmatprep.mubr.msk.f32.mxu0 %vm1383_vm0, %v1382_v0 }
  0x1a   :  { %1180 = vmatpush3.msra.mxu0 %v1450_v6  ;;  %1186 = vmatprep.subr.mxu1 %v1382_v0 }
  0x1b   :  { %1181 = vmatprep.subr.mxu0 %v1382_v0  ;;  %1187 = vmatpush3.msra.mxu1 %v1434_v2 }
  0x1c   :  { %1182 = vmatpush3.msra.mxu0 %v1457_v7  ;;  %1188 = vmatprep.subr.mxu1 %v1382_v0 }
  0x1d   :  { %1189 = vmatpush3.msra.mxu1 %v1440_v4  ;;  %1194 = vmatprep.mubr.msk.f32.mxu1 %vm1383_vm0, %v1382_v0 }
  0x1e   :  { %1190 = vmatprep.subr.mxu1 %v1382_v0  ;;  %1197 = vmatprep.subr.mxu0 %v1382_v0 }
  0x1f   :  { %1191 = vmatpush3.msra.mxu1 %v1450_v6 }
  0x20   :  { %1192 = vmatprep.subr.mxu1 %v1382_v0 }
  0x21   :  { %1193 = vmatpush3.msra.mxu1 %v1457_v7 }
  0x22   :  { %1208 = vmatprep.subr.mxu1 %v1382_v0 }
  0xd4   :  { %v122_v9 = vpop.f32.mrf.mxu0 }
  0xd5   :  { %v1488_v10 = vadd.f32 %v1090_v8, %v122_v9 }
  0xd6   :  { %v1163_v11 = vpop.f32.mrf.mxu0 }
  0xd8   :  { %v196_v12 = vpop.f32.mrf.mxu1 }
  0xd9   :  { %v200_v13 = vadd.f32 %v196_v12, %v1488_v10 }
  0xda   :  { %v1174_v14 = vpop.f32.mrf.mxu1 }
  0xdb   :  { %1271 = vtanh.f32 %v200_v13  ;;  %v1092_v16 = vmul.f32 -1.442695, %v200_v13 }
  0xdd   :  { %1273 = vpow2.f32 %v1092_v16 }
  0xe8   :  { %v1272_v15 = vpop.eup %1271 }
  0xe9   :  { %210 = vrot.lane.b32.xlu0 %v1272_v15, %s1384_s13 }
  0xea   :  { %v1274_v17 = vpop.eup %1273 }
  0xeb   :  { %v204_v18 = vadd.f32 1.0, %v1274_v17 }
  0xed   :  { %1275 = vrcp.f32 %v204_v18 }
  0xfa   :  { %v1276_v19 = vpop.eup %1275 }
  0xfb   :  { %v208_v22 = vmul.f32 0.0, %v1276_v19 }
 0x15b   :  { %v211_v20 = vpop.permute.xlu0 %210 }
 0x15c   :  { %v213_v21 = vmul.f32 %v1276_v19, %v211_v20 }
 0x15e   :  { %215 = vrot.lane.b32.xlu0 %v213_v21, %s1385_s3 }
 0x1d0   :  { %v216_v23 = vpop.permute.xlu0 %215 }
 0x1d1   :  { %v218_v24 = vadd.f32 %v216_v23, %v208_v22 }
 0x1d3   :  { %1277 = vtanh.f32 %v218_v24  ;;  %v312_v40 = vrot.slane %v218_v24, 7 }
 0x1e0   :  { %v1278_v25 = vpop.eup %1277 }
 0x1e1   :  { %221 = vrot.lane.b32.xlu1 %v1278_v25, %s1384_s13 }
 0x253   :  { %v222_v26 = vpop.permute.xlu1 %221 }
 0x254   :  { %v1494_v27 = vmul.f32 %v1276_v19, %v222_v26 }
 0x256   :  { %226 = vrot.lane.b32.xlu1 %v1494_v27, %s1385_s3 }
 0x2c8   :  { %v227_v28 = vpop.permute.xlu1 %226 }
 0x2c9   :  { %1184 = vmatmul.mubr.msk.f32.vlgmr.msra.gmra.mxu0 %vm126_vm2, %v227_v28 }
 0x2ca   :  { %1198 = vmatpush3.msra.mxu0 %v1434_v2  ;;  %1205 = vmatprep.mubr.msk.f32.mxu0 %vm1383_vm0, %v1382_v0 }
 0x2cb   :  { %1199 = vmatprep.subr.mxu0 %v1382_v0 }
 0x2cc   :  { %1200 = vmatpush3.msra.mxu0 %v1440_v4 }
 0x2cd   :  { %1201 = vmatprep.subr.mxu0 %v1382_v0 }
 0x2ce   :  { %1202 = vmatpush3.msra.mxu0 %v1450_v6 }
 0x2cf   :  { %1203 = vmatprep.subr.mxu0 %v1382_v0 }
 0x2d0   :  { %1204 = vmatpush3.msra.mxu0 %v1457_v7 }
 0x2d1   :  { %1219 = vmatprep.subr.mxu0 %v1382_v0 }
 0x389   :  { %v296_v29 = vpop.f32.mrf.mxu0 }
 0x38a   :  { %v301_v30 = vrot.slane %v296_v29, 7 }
 0x38b   :  { %v1185_v31 = vpop.f32.mrf.mxu0 }
 0x38c   :  { %v303_v32 = vadd.f32 %v301_v30, %v1488_v10 }
 0x38e   :  { %1279 = vtanh.f32 %v303_v32  ;;  %v1094_v34 = vmul.f32 -1.442695, %v303_v32 }
 0x390   :  { %1281 = vpow2.f32 %v1094_v34 }
 0x39b   :  { %v1280_v33 = vpop.eup %1279 }
 0x39c   :  { %316 = vrot.lane.b32.xlu0 %v1280_v33, %s1384_s13 }
 0x39d   :  { %v1282_v35 = vpop.eup %1281 }
 0x39e   :  { %v307_v36 = vadd.f32 1.0, %v1282_v35 }
 0x3a0   :  { %1283 = vrcp.f32 %v307_v36 }
 0x3ad   :  { %v1284_v37 = vpop.eup %1283 }
 0x3ae   :  { %v314_v41 = vmul.f32 %v1284_v37, %v312_v40 }
 0x40e   :  { %v317_v38 = vpop.permute.xlu0 %316 }
 0x40f   :  { %v319_v39 = vmul.f32 %v1284_v37, %v317_v38 }
 0x411   :  { %321 = vrot.lane.b32.xlu1 %v319_v39, %s1385_s3 }
 0x483   :  { %v322_v42 = vpop.permute.xlu1 %321 }
 0x484   :  { %v324_v43 = vadd.f32 %v322_v42, %v314_v41 }
 0x486   :  { %1285 = vtanh.f32 %v324_v43  ;;  %v419_v60 = vrot.slane %v324_v43, 7 }
 0x493   :  { %v1286_v44 = vpop.eup %1285 }
 0x494   :  { %327 = vrot.lane.b32.xlu0 %v1286_v44, %s1384_s13 }
 0x506   :  { %v328_v45 = vpop.permute.xlu0 %327 }
 0x507   :  { %v330_v46 = vmul.f32 %v1284_v37, %v328_v45 }
 0x509   :  { %v332_v47 = vrot.slane %v330_v46, 1  ;;  %v974_v8 = vsel %vm973_vm3, %v1494_v27, %v330_v46 }
 0x50b   :  { %333 = vrot.lane.b32.xlu1 %v332_v47, %s1385_s3 }
 0x57d   :  { %v334_v48 = vpop.permute.xlu1 %333 }
 0x57e   :  { %1195 = vmatmul.mubr.msk.f32.vlgmr.msra.gmra.mxu1 %vm126_vm2, %v334_v48 }
 0x57f   :  { %1209 = vmatpush3.msra.mxu1 %v1434_v2  ;;  %1216 = vmatprep.mubr.msk.f32.mxu1 %vm1383_vm0, %v1382_v0 }
 0x580   :  { %1210 = vmatprep.subr.mxu1 %v1382_v0 }
 0x581   :  { %1211 = vmatpush3.msra.mxu1 %v1440_v4 }
 0x582   :  { %1212 = vmatprep.subr.mxu1 %v1382_v0 }
 0x583   :  { %1213 = vmatpush3.msra.mxu1 %v1450_v6 }
 0x584   :  { %1214 = vmatprep.subr.mxu1 %v1382_v0 }
 0x585   :  { %1215 = vmatpush3.msra.mxu1 %v1457_v7 }
 0x586   :  { %1230 = vmatprep.subr.mxu1 %v1382_v0 }
 0x63e   :  { %v403_v49 = vpop.f32.mrf.mxu1 }
 0x63f   :  { %v408_v50 = vrot.slane %v403_v49, 6 }
 0x640   :  { %v1196_v51 = vpop.f32.mrf.mxu1 }
 0x641   :  { %v410_v52 = vadd.f32 %v408_v50, %v1488_v10 }
 0x643   :  { %1287 = vtanh.f32 %v410_v52  ;;  %v1096_v54 = vmul.f32 -1.442695, %v410_v52 }
 0x645   :  { %1289 = vpow2.f32 %v1096_v54 }
 0x650   :  { %v1288_v53 = vpop.eup %1287 }
 0x651   :  { %423 = vrot.lane.b32.xlu0 %v1288_v53, %s1384_s13 }
 0x652   :  { %v1290_v55 = vpop.eup %1289 }
 0x653   :  { %v414_v56 = vadd.f32 1.0, %v1290_v55 }
 0x655   :  { %1291 = vrcp.f32 %v414_v56 }
 0x662   :  { %v1292_v57 = vpop.eup %1291 }
 0x663   :  { %v421_v61 = vmul.f32 %v1292_v57, %v419_v60 }
 0x6c3   :  { %v424_v58 = vpop.permute.xlu0 %423 }
 0x6c4   :  { %v426_v59 = vmul.f32 %v1292_v57, %v424_v58 }
 0x6c6   :  { %428 = vrot.lane.b32.xlu1 %v426_v59, %s1385_s3 }
 0x738   :  { %v429_v62 = vpop.permute.xlu1 %428 }
 0x739   :  { %v431_v63 = vadd.f32 %v429_v62, %v421_v61 }
 0x73b   :  { %1293 = vtanh.f32 %v431_v63  ;;  %v526_v24 = vrot.slane %v431_v63, 7 }
 0x748   :  { %v1294_v1 = vpop.eup %1293 }
 0x749   :  { %434 = vrot.lane.b32.xlu0 %v1294_v1, %s1384_s13 }
 0x7bb   :  { %v435_v3 = vpop.permute.xlu0 %434 }
 0x7bc   :  { %v437_v5 = vmul.f32 %v1292_v57, %v435_v3 }
 0x7be   :  { %v439_v9 = vrot.slane %v437_v5, 2  ;;  %v976_v11 = vsel %vm975_vm4, %v974_v8, %v437_v5 }
 0x7c0   :  { %440 = vrot.lane.b32.xlu1 %v439_v9, %s1385_s3 }
 0x832   :  { %v441_v12 = vpop.permute.xlu1 %440 }
 0x833   :  { %1206 = vmatmul.mubr.msk.f32.vlgmr.msra.gmra.mxu0 %vm126_vm2, %v441_v12 }
 0x834   :  { %1220 = vmatpush3.msra.mxu0 %v1434_v2  ;;  %1227 = vmatprep.mubr.msk.f32.mxu0 %vm1383_vm0, %v1382_v0 }
 0x835   :  { %1221 = vmatprep.subr.mxu0 %v1382_v0 }
 0x836   :  { %1222 = vmatpush3.msra.mxu0 %v1440_v4 }
 0x837   :  { %1223 = vmatprep.subr.mxu0 %v1382_v0 }
 0x838   :  { %1224 = vmatpush3.msra.mxu0 %v1450_v6 }
 0x839   :  { %1225 = vmatprep.subr.mxu0 %v1382_v0 }
 0x83a   :  { %1226 = vmatpush3.msra.mxu0 %v1457_v7 }
 0x83b   :  { %1241 = vmatprep.subr.mxu0 %v1382_v0 }
 0x8f3   :  { %v510_v13 = vpop.f32.mrf.mxu0 }
 0x8f4   :  { %v515_v14 = vrot.slane %v510_v13, 5 }
 0x8f5   :  { %v1207_v15 = vpop.f32.mrf.mxu0 }
 0x8f6   :  { %v517_v16 = vadd.f32 %v515_v14, %v1488_v10 }
 0x8f8   :  { %1295 = vtanh.f32 %v517_v16  ;;  %v1098_v18 = vmul.f32 -1.442695, %v517_v16 }
 0x8fa   :  { %1297 = vpow2.f32 %v1098_v18 }
 0x905   :  { %v1296_v17 = vpop.eup %1295 }
 0x906   :  { %530 = vrot.lane.b32.xlu0 %v1296_v17, %s1384_s13 }
 0x907   :  { %v1298_v19 = vpop.eup %1297 }
 0x908   :  { %v521_v20 = vadd.f32 1.0, %v1298_v19 }
 0x90a   :  { %1299 = vrcp.f32 %v521_v20 }
 0x917   :  { %v1300_v21 = vpop.eup %1299 }
 0x918   :  { %v528_v25 = vmul.f32 %v1300_v21, %v526_v24 }
 0x978   :  { %v531_v22 = vpop.permute.xlu0 %530 }
 0x979   :  { %v533_v23 = vmul.f32 %v1300_v21, %v531_v22 }
 0x97b   :  { %535 = vrot.lane.b32.xlu1 %v533_v23, %s1385_s3 }
 0x9ed   :  { %v536_v26 = vpop.permute.xlu1 %535 }
 0x9ee   :  { %v538_v27 = vadd.f32 %v536_v26, %v528_v25 }
 0x9f0   :  { %1301 = vtanh.f32 %v538_v27  ;;  %v633_v45 = vrot.slane %v538_v27, 7 }
 0x9fd   :  { %v1302_v28 = vpop.eup %1301 }
 0x9fe   :  { %541 = vrot.lane.b32.xlu0 %v1302_v28, %s1384_s13 }
 0xa70   :  { %v542_v29 = vpop.permute.xlu0 %541 }
 0xa71   :  { %v544_v30 = vmul.f32 %v1300_v21, %v542_v29 }
 0xa73   :  { %v546_v31 = vrot.slane %v544_v30, 3  ;;  %v978_v32 = vsel %vm977_vm5, %v976_v11, %v544_v30 }
 0xa75   :  { %547 = vrot.lane.b32.xlu1 %v546_v31, %s1385_s3 }
 0xae7   :  { %v548_v33 = vpop.permute.xlu1 %547 }
 0xae8   :  { %1217 = vmatmul.mubr.msk.f32.vlgmr.msra.gmra.mxu1 %vm126_vm2, %v548_v33 }
 0xae9   :  { %1231 = vmatpush3.msra.mxu1 %v1434_v2  ;;  %1238 = vmatprep.mubr.msk.f32.mxu1 %vm1383_vm0, %v1382_v0 }
 0xaea   :  { %1232 = vmatprep.subr.mxu1 %v1382_v0 }
 0xaeb   :  { %1233 = vmatpush3.msra.mxu1 %v1440_v4 }
 0xaec   :  { %1234 = vmatprep.subr.mxu1 %v1382_v0 }
 0xaed   :  { %1235 = vmatpush3.msra.mxu1 %v1450_v6 }
 0xaee   :  { %1236 = vmatprep.subr.mxu1 %v1382_v0 }
 0xaef   :  { %1237 = vmatpush3.msra.mxu1 %v1457_v7 }
 0xaf0   :  { %1252 = vmatprep.subr.mxu1 %v1382_v0 }
 0xba8   :  { %v617_v34 = vpop.f32.mrf.mxu1 }
 0xba9   :  { %v622_v35 = vrot.slane %v617_v34, 4 }
 0xbaa   :  { %v1218_v36 = vpop.f32.mrf.mxu1 }
 0xbab   :  { %v624_v37 = vadd.f32 %v622_v35, %v1488_v10 }
 0xbad   :  { %1303 = vtanh.f32 %v624_v37  ;;  %v1100_v39 = vmul.f32 -1.442695, %v624_v37 }
 0xbaf   :  { %1305 = vpow2.f32 %v1100_v39 }
 0xbba   :  { %v1304_v38 = vpop.eup %1303 }
 0xbbb   :  { %637 = vrot.lane.b32.xlu0 %v1304_v38, %s1384_s13 }
 0xbbc   :  { %v1306_v40 = vpop.eup %1305 }
 0xbbd   :  { %v628_v41 = vadd.f32 1.0, %v1306_v40 }
 0xbbf   :  { %1307 = vrcp.f32 %v628_v41 }
 0xbcc   :  { %v1308_v42 = vpop.eup %1307 }
 0xbcd   :  { %v635_v46 = vmul.f32 %v1308_v42, %v633_v45 }
 0xc2d   :  { %v638_v43 = vpop.permute.xlu0 %637 }
 0xc2e   :  { %v640_v44 = vmul.f32 %v1308_v42, %v638_v43 }
 0xc30   :  { %642 = vrot.lane.b32.xlu1 %v640_v44, %s1385_s3 }
 0xca2   :  { %v643_v47 = vpop.permute.xlu1 %642 }
 0xca3   :  { %v645_v48 = vadd.f32 %v643_v47, %v635_v46 }
 0xca5   :  { %1309 = vtanh.f32 %v645_v48 }
 0xcb2   :  { %v1310_v49 = vpop.eup %1309 }
 0xcb3   :  { %648 = vrot.lane.b32.xlu0 %v1310_v49, %s1384_s13 }
 0xd25   :  { %v649_v50 = vpop.permute.xlu0 %648 }
 0xd26   :  { %v651_v51 = vmul.f32 %v1308_v42, %v649_v50  ;;  %v989_v50 = vld [vmem:[%s1618_s4 + $0x10] sm:$0xff] }
 0xd28   :  { %v653_v52 = vrot.slane %v651_v51, 4  ;;  %v980_v53 = vsel %vm979_vm6, %v978_v32, %v651_v51  ;;  %v988_v51 = vld [vmem:[%s1618_s4 + $0x8] sm:$0xff] }
 0xd2a   :  { %654 = vrot.lane.b32.xlu1 %v653_v52, %s1385_s3  ;;  %v987_v52 = vld [vmem:[%s1618_s4] sm:$0xff] }
 0xd9c   :  { %v655_v54 = vpop.permute.xlu1 %654 }
 0xd9d   :  { %1228 = vmatmul.mubr.msk.f32.vlgmr.msra.gmra.mxu0 %vm126_vm2, %v655_v54 }
 0xd9e   :  { %1242 = vmatpush3.msra.mxu0 %v1434_v2  ;;  %1249 = vmatprep.mubr.msk.f32.mxu0 %vm1383_vm0, %v1382_v0 }
 0xd9f   :  { %1243 = vmatprep.subr.mxu0 %v1382_v0 }
 0xda0   :  { %1244 = vmatpush3.msra.mxu0 %v1440_v4 }
 0xda1   :  { %1245 = vmatprep.subr.mxu0 %v1382_v0 }
 0xda2   :  { %1246 = vmatpush3.msra.mxu0 %v1450_v6 }
 0xda3   :  { %1247 = vmatprep.subr.mxu0 %v1382_v0 }
 0xda4   :  { %1248 = vmatpush3.msra.mxu0 %v1457_v7  ;;  %v740_v7 = vrot.slane %v645_v48, 7 }
 0xe5d   :  { %v724_v55 = vpop.f32.mrf.mxu0 }
 0xe5e   :  { %v729_v56 = vrot.slane %v724_v55, 3 }
 0xe5f   :  { %v1229_v57 = vpop.f32.mrf.mxu0 }
 0xe60   :  { %v731_v2 = vadd.f32 %v729_v56, %v1488_v10 }
 0xe62   :  { %1311 = vtanh.f32 %v731_v2  ;;  %v1102_v59 = vmul.f32 -1.442695, %v731_v2  ;;  %v1107_v2 = vld [vmem:[%s1619_s5] ss:$0 sm:$0xff] }
 0xe64   :  { %1313 = vpow2.f32 %v1102_v59 }
 0xe6f   :  { %v1312_v58 = vpop.eup %1311 }
 0xe70   :  { %744 = vrot.lane.b32.xlu0 %v1312_v58, %s1384_s13 }
 0xe71   :  { %v1314_v4 = vpop.eup %1313 }
 0xe72   :  { %v735_v60 = vadd.f32 1.0, %v1314_v4 }
 0xe74   :  { %1315 = vrcp.f32 %v735_v60 }
 0xe81   :  { %v1316_v61 = vpop.eup %1315 }
 0xe82   :  { %v742_v63 = vmul.f32 %v1316_v61, %v740_v7 }
 0xee2   :  { %v745_v6 = vpop.permute.xlu0 %744 }
 0xee3   :  { %v747_v62 = vmul.f32 %v1316_v61, %v745_v6 }
 0xee5   :  { %749 = vrot.lane.b32.xlu1 %v747_v62, %s1385_s3 }
 0xf57   :  { %v750_v1 = vpop.permute.xlu1 %749 }
 0xf58   :  { %v752_v3 = vadd.f32 %v750_v1, %v742_v63 }
 0xf5a   :  { %1317 = vtanh.f32 %v752_v3  ;;  %v847_v25 = vrot.slane %v752_v3, 7 }
 0xf67   :  { %v1318_v5 = vpop.eup %1317 }
 0xf68   :  { %755 = vrot.lane.b32.xlu0 %v1318_v5, %s1384_s13 }
 0xfda   :  { %v756_v8 = vpop.permute.xlu0 %755 }
 0xfdb   :  { %v758_v9 = vmul.f32 %v1316_v61, %v756_v8 }
 0xfdd   :  { %v760_v11 = vrot.slane %v758_v9, 5  ;;  %v982_v12 = vsel %vm981_vm7, %v980_v53, %v758_v9 }
 0xfdf   :  { %761 = vrot.lane.b32.xlu1 %v760_v11, %s1385_s3 }
0x1051   :  { %v762_v13 = vpop.permute.xlu1 %761 }
0x1052   :  { %1239 = vmatmul.mubr.msk.f32.vlgmr.msra.gmra.mxu1 %vm126_vm2, %v762_v13 }
0x1053   :  { %1260 = vmatprep.mubr.msk.f32.mxu1 %vm1383_vm0, %v1382_v0 }
0x1112   :  { %v831_v14 = vpop.f32.mrf.mxu1 }
0x1113   :  { %v836_v15 = vrot.slane %v831_v14, 2 }
0x1114   :  { %v1240_v16 = vpop.f32.mrf.mxu1 }
0x1115   :  { %v838_v17 = vadd.f32 %v836_v15, %v1488_v10 }
0x1117   :  { %1319 = vtanh.f32 %v838_v17  ;;  %v1104_v19 = vmul.f32 -1.442695, %v838_v17 }
0x1119   :  { %1321 = vpow2.f32 %v1104_v19 }
0x1124   :  { %v1320_v18 = vpop.eup %1319 }
0x1125   :  { %851 = vrot.lane.b32.xlu0 %v1320_v18, %s1384_s13 }
0x1126   :  { %v1322_v20 = vpop.eup %1321 }
0x1127   :  { %v842_v21 = vadd.f32 1.0, %v1322_v20 }
0x1129   :  { %1323 = vrcp.f32 %v842_v21 }
0x1136   :  { %v1324_v22 = vpop.eup %1323 }
0x1137   :  { %v849_v26 = vmul.f32 %v1324_v22, %v847_v25 }
0x1197   :  { %v852_v23 = vpop.permute.xlu0 %851 }
0x1198   :  { %v854_v24 = vmul.f32 %v1324_v22, %v852_v23 }
0x119a   :  { %856 = vrot.lane.b32.xlu1 %v854_v24, %s1385_s3 }
0x120c   :  { %v857_v27 = vpop.permute.xlu1 %856 }
0x120d   :  { %v859_v28 = vadd.f32 %v857_v27, %v849_v26 }
0x120f   :  { %1325 = vtanh.f32 %v859_v28  ;;  %v954_v46 = vrot.slane %v859_v28, 7 }
0x121c   :  { %v1326_v29 = vpop.eup %1325 }
0x121d   :  { %862 = vrot.lane.b32.xlu0 %v1326_v29, %s1384_s13 }
0x128f   :  { %v863_v30 = vpop.permute.xlu0 %862 }
0x1290   :  { %v865_v31 = vmul.f32 %v1324_v22, %v863_v30 }
0x1292   :  { %v867_v32 = vrot.slane %v865_v31, 6  ;;  %v984_v33 = vsel %vm983_vm8, %v982_v12, %v865_v31 }
0x1294   :  { %868 = vrot.lane.b32.xlu1 %v867_v32, %s1385_s3 }
0x1306   :  { %v869_v34 = vpop.permute.xlu1 %868 }
0x1307   :  { %1250 = vmatmul.mubr.msk.f32.vlgmr.msra.gmra.mxu0 %vm126_vm2, %v869_v34 }
0x13c7   :  { %v938_v35 = vpop.f32.mrf.mxu0 }
0x13c8   :  { %v943_v36 = vrot.slane %v938_v35, 1 }
0x13c9   :  { %v1251_v37 = vpop.f32.mrf.mxu0 }
0x13ca   :  { %v945_v38 = vadd.f32 %v943_v36, %v1488_v10  ;;  %v990_v10 = vld [vmem:[%s1618_s4 + $0x18] sm:$0xff]  ;;  %s1386_s4 = smov [#allocation5]  }
0x13cb   :  { %1253 = vmatpush3.msra.mxu1 %v990_v10  ;;  %s1081_s24 = sshll.u32 %s1386_s4, 4  ;;  %s1082_s24 = int_to_ptr.vmem [resolvable:$true] %s1081_s24 }
0x13cc   :  { %1327 = vtanh.f32 %v945_v38  ;;  %v1106_v40 = vmul.f32 -1.442695, %v945_v38  ;;  %1254 = vmatprep.subr.mxu1 %v1382_v0  ;;  %s1355_s25 = scalar_lea.vmem %s1082_s24, 128  ;;  %p1360_p6 = scmp.lt.s32.totalorder %s1082_s24, %s1082_s24 }
0x13cd   :  { %1255 = vmatpush3.msra.mxu1 %v989_v50  ;;  %p1356_p5 = scmp.ne.s32.totalorder %s1082_s24, %s1355_s25  ;;  %p1361_p7 = scmp.lt.s32.totalorder %s1355_s25, %s1355_s25 }
0x13ce   :  { %1329 = vpow2.f32 %v1106_v40  ;;  %1256 = vmatprep.subr.mxu1 %v1382_v0 }
0x13cf   :  { %1257 = vmatpush3.msra.mxu1 %v988_v51  ;;  %p1362_p8 = por %p1361_p7, %p1360_p6 }
0x13d0   :  { %1258 = vmatprep.subr.mxu1 %v1382_v0 }
0x13d1   :  { %1259 = vmatpush3.msra.mxu1 %v987_v52  ;;  %p1363_p9 = pnand %p1362_p8, %p1356_p5 }
0x13d9   :  { %v1328_v39 = vpop.eup %1327 }
0x13da   :  { %958 = vrot.lane.b32.xlu0 %v1328_v39, %s1384_s13 }
0x13db   :  { %v1330_v41 = vpop.eup %1329 }
0x13dc   :  { %v949_v42 = vadd.f32 1.0, %v1330_v41 }
0x13de   :  { %1331 = vrcp.f32 %v949_v42 }
0x13eb   :  { %v1332_v43 = vpop.eup %1331 }
0x13ec   :  { %v956_v47 = vmul.f32 %v1332_v43, %v954_v46 }
0x144c   :  { %v959_v44 = vpop.permute.xlu0 %958 }
0x144d   :  { %v961_v45 = vmul.f32 %v1332_v43, %v959_v44 }
0x144f   :  { %963 = vrot.lane.b32.xlu1 %v961_v45, %s1385_s3 }
0x14c1   :  { %v964_v48 = vpop.permute.xlu1 %963 }
0x14c2   :  { %v966_v49 = vadd.f32 %v964_v48, %v956_v47 }
0x14c4   :  { %1333 = vtanh.f32 %v966_v49 }
0x14d1   :  { %v1334_v53 = vpop.eup %1333 }
0x14d2   :  { %969 = vrot.lane.b32.xlu0 %v1334_v53, %s1384_s13 }
0x1544   :  { %v970_v54 = vpop.permute.xlu0 %969 }
0x1545   :  { %v972_v55 = vmul.f32 %v1332_v43, %v970_v54 }
0x1547   :  { %v986_v56 = vsel %vm985_vm9, %v984_v33, %v972_v55 }
0x1548   :  { %999 = vrot.lane.b32.xlu1 %v986_v56, %s1385_s3 }
0x15ba   :  { %v1000_v57 = vpop.permute.xlu1 %999 }
0x15bb   :  { %1261 = vmatmul.mubr.msk.f32.vlgmr.msra.gmra.mxu1 %vm126_vm2, %v1000_v57 }
0x167b   :  { %v1069_v0 = vpop.f32.mrf.mxu1 }
0x167c   :  { %v1070_v58 = vadd.f32 %v1107_v2, %v1069_v0 }
0x167d   :  { %v1262_v59 = vpop.f32.mrf.mxu1 }
0x167e   :  { %1074 = vst.msk [vmem:[#allocation5] sm:$0xff] %vm1073_vm10, %v1070_v58 }
0x167f   :  { %1366 = shalt.err (!%p1363_p9)
}
0x1680   :  { %1084 = dma.vmem_to_hbm [thread:$0]  %s1082_s24, 128, %s1620_s6, [#allocation4]  }
0x1681   :  { %1377 = dma.done.wait [#allocation4], 128  }
0x1682   :  { %1378 = vsyncadd [#allocation4], 4294967168 }
0x1683   :  { %1088 = vsyncpa [#allocation3], 1 }
0x1684   :  { %1089 = vsyncpa [#allocation4], 1 }

</bundles_post_ra>
